<compile_context>
chip_gen: v7x
topology: tpu7x:2x2x1
jax: 0.10.0
libtpu: 0.0.40
codegen_flags: <defaults>
</compile_context>

<pallas_src>
import functools
import math

import jax
import jax.numpy as jnp
from jax import lax
from jax.experimental import pallas as pl
from jax.experimental.pallas import tpu as pltpu


def _causal_attn_kernel(x_ref, w_ref, o_ref, *, d_out):
    # x_ref: (1, T, d_in)    bf16 -- one batch element
    # w_ref: (d_in, 3*d_out) bf16 -- packed [Wq * 1/sqrt(d_out) | Wk | Wv]
    # o_ref: (1, T, d_out)   f32
    x = x_ref[0]                                            # (T, d_in)
    T = x.shape[0]

    # Fused Q/K/V projection: one (T, d_in) x (d_in, 3*d_out) MXU matmul,
    # bf16 operands, f32 accumulation.
    qkv = jnp.dot(x, w_ref[...], preferred_element_type=jnp.float32)
    # Cast once so both downstream matmuls (QK^T, attn@V) run with bf16
    # operands at full MXU rate while keeping f32 accumulation.
    qkv = qkv.astype(jnp.bfloat16)                          # (T, 3*d_out)

    q = qkv[:, :d_out]                  # 1/sqrt(d_out) already folded into Wq
    k = qkv[:, d_out:2 * d_out]
    v = qkv[:, 2 * d_out:]

    # scores = q @ k^T, contracting the last dims (NT matmul, no explicit
    # transpose of k / XLU vxpose), f32 accumulation.
    s = lax.dot_general(q, k, (((1,), (1,)), ((), ())),
                        preferred_element_type=jnp.float32)  # (T, T)

    # Causal mask: allow col <= row. -inf is safe for pure causal masking
    # because the diagonal is always allowed (no fully-masked rows -> no NaN).
    row = lax.broadcasted_iota(jnp.int32, (T, T), 0)
    col = lax.broadcasted_iota(jnp.int32, (T, T), 1)
    s = jnp.where(col <= row, s, -jnp.inf)

    # Numerically stable softmax in f32; normalization deferred to the
    # (T, d_out) context, reciprocal on the EUP (separate bundle slot).
    m = jnp.max(s, axis=-1, keepdims=True)
    e = jnp.exp(s - m)                                       # (T, T) f32
    denom = jnp.sum(e, axis=-1, keepdims=True)               # (T, 1)

    ctx = jnp.dot(e.astype(jnp.bfloat16), v,
                  preferred_element_type=jnp.float32)        # (T, d_out)
    ctx = ctx * pl.reciprocal(denom, approx=True)

    # Single store; with d_out a multiple of 128 lanes this is unmasked /
    # lane-dense.
    o_ref[0] = ctx.astype(o_ref.dtype)


def causal_attention(x, wq, wk, wv):
    """Eval-mode CausalAttention forward.

    x: (B, T, d_in); wq/wk/wv: (d_in, d_out). Returns (B, T, d_out)."""
    B, T, d_in = x.shape
    d_out = wq.shape[-1]

    # Host-side pack: fold the 1/sqrt(d_out) softmax scale into W_query and
    # pack [Q | K | V] so the kernel does a single wide projection matmul.
    scale = 1.0 / math.sqrt(float(d_out))
    w_qkv = jnp.concatenate(
        [wq.astype(jnp.float32) * scale,
         wk.astype(jnp.float32),
         wv.astype(jnp.float32)],
        axis=-1).astype(jnp.bfloat16)                        # (d_in, 3*d_out)

    x_bf16 = x.astype(jnp.bfloat16)

    kernel = functools.partial(_causal_attn_kernel, d_out=d_out)

    # grid=(B,) kept "parallel" and >=2 wide so both v7x TensorCores get work;
    # on v5e/v6e the batch could be folded into one step (fewer fixed-overhead
    # grid steps, more MXU rows per matmul) -- gate per generation.
    return pl.pallas_call(
        kernel,
        out_shape=jax.ShapeDtypeStruct((B, T, d_out), jnp.float32),
        grid_spec=pltpu.PrefetchScalarGridSpec(
            num_scalar_prefetch=0,
            grid=(B,),
            in_specs=[
                pl.BlockSpec((1, T, d_in), lambda b: (b, 0, 0)),
                # Block-index invariant -> weights DMA'd into VMEM once.
                pl.BlockSpec((d_in, 3 * d_out), lambda b: (0, 0)),
            ],
            out_specs=pl.BlockSpec((1, T, d_out), lambda b: (b, 0, 0)),
        ),
        compiler_params=pltpu.CompilerParams(
            dimension_semantics=("parallel",),
        ),
    )(x_bf16, w_qkv)


def _reference(x_bf16, wq_bf16, wk_bf16, wv_bf16):
    """Pure-JAX f32 reference mirroring the PyTorch forward (eval mode),
    evaluated on the same bf16-quantized inputs the kernel sees."""
    x = x_bf16.astype(jnp.float32)
    _, T, _ = x.shape
    d_out = wq_bf16.shape[-1]
    q = x @ wq_bf16.astype(jnp.float32)
    k = x @ wk_bf16.astype(jnp.float32)
    v = x @ wv_bf16.astype(jnp.float32)
    scores = q @ jnp.swapaxes(k, 1, 2)
    mask = jnp.triu(jnp.ones((T, T), dtype=bool), k=1)
    scores = jnp.where(mask[None], -jnp.inf, scores)
    w = jax.nn.softmax(scores / math.sqrt(d_out), axis=-1)
    return w @ v


if __name__ == "__main__":
    # Small shapes consistent with the module (context_length == T).
    # d_out is chosen as a lane-width multiple (128) so the output store is
    # lane-dense and every matmul dim is MXU friendly.
    B, T, d_in, d_out = 2, 8, 64, 128

    key = jax.random.PRNGKey(0)
    kx, kq, kk, kv = jax.random.split(key, 4)

    x = jax.random.normal(kx, (B, T, d_in), dtype=jnp.float32)
    init = 1.0 / math.sqrt(d_in)
    wq = jax.random.normal(kq, (d_in, d_out), dtype=jnp.float32) * init
    wk = jax.random.normal(kk, (d_in, d_out), dtype=jnp.float32) * init
    wv = jax.random.normal(kv, (d_in, d_out), dtype=jnp.float32) * init

    # Quantize once up front so the kernel and the reference see identical
    # bf16 values (the comparison then only measures kernel-side rounding).
    x_bf16 = x.astype(jnp.bfloat16)
    wq_bf16 = wq.astype(jnp.bfloat16)
    wk_bf16 = wk.astype(jnp.bfloat16)
    wv_bf16 = wv.astype(jnp.bfloat16)

    y = causal_attention(x_bf16, wq_bf16, wk_bf16, wv_bf16)
    y = jax.block_until_ready(y)

    y_ref = _reference(x_bf16, wq_bf16, wk_bf16, wv_bf16)
    assert y.shape == (B, T, d_out), y.shape
    max_err = float(jnp.max(jnp.abs(y - y_ref)))
    # Tolerance covers bf16 MXU operands on BOTH matmuls (QK^T and attn@V),
    # the scale folded into bf16 W_query, and the approximate EUP reciprocal
    # vs. the full-f32 reference.
    assert jnp.allclose(y, y_ref, atol=3e-2, rtol=3e-2), f"mismatch: {max_err}"

    print("KERNEL_OK")
</pallas_src>

<mosaic_0001>
module attributes {stable_mosaic.version = 11 : i64} {
  func.func @_causal_attn_kernel(%arg0: i32, %arg1: memref<1x8x64xbf16, #tpu.memory_space<vmem>>, %arg2: memref<64x384xbf16, #tpu.memory_space<vmem>>, %arg3: memref<1x8x128xf32, #tpu.memory_space<vmem>>) attributes {dimension_semantics = [#tpu.dimension_semantics<parallel>], iteration_bounds = array<i64: 2>, scalar_prefetch = 0 : i64, scratch_operands = 0 : i64, tpu.core_type = #tpu.core_type<tc>, window_params = [{transform_indices = @transform_0, window_bounds = array<i64: 1, 8, 64>}, {pipeline_mode = #tpu.pipeline_mode<synchronous>, transform_indices = @transform_1, window_bounds = array<i64: 64, 384>}, {transform_indices = @transform_2, window_bounds = array<i64: 1, 8, 128>}]} {
    %c0 = arith.constant 0 : index
    %c0_0 = arith.constant 0 : index
    %c0_1 = arith.constant 0 : index
    %0 = vector.load %arg1[%c0, %c0_0, %c0_1] : memref<1x8x64xbf16, #tpu.memory_space<vmem>>, vector<1x8x64xbf16>
    %1 = vector.shape_cast %0 : vector<1x8x64xbf16> to vector<8x64xbf16>
    %c0_2 = arith.constant 0 : index
    %c0_3 = arith.constant 0 : index
    %2 = vector.load %arg2[%c0_2, %c0_3] : memref<64x384xbf16, #tpu.memory_space<vmem>>, vector<64x384xbf16>
    %cst = arith.constant dense<0.000000e+00> : vector<8x384xf32>
    %3 = tpu.matmul %1, %2, %cst {dimension_numbers = #tpu.dot_dimension_numbers<[1], [0], [0], [1], [0, 0, 1, 1], [], []>} : vector<8x64xbf16>, vector<64x384xbf16>, vector<8x384xf32> -> vector<8x384xf32>
    %4 = arith.truncf %3 : vector<8x384xf32> to vector<8x384xbf16>
    %5 = vector.extract_strided_slice %4 {offsets = [0, 0], sizes = [8, 128], strides = [1, 1]} : vector<8x384xbf16> to vector<8x128xbf16>
    %6 = vector.extract_strided_slice %4 {offsets = [0, 128], sizes = [8, 128], strides = [1, 1]} : vector<8x384xbf16> to vector<8x128xbf16>
    %7 = vector.extract_strided_slice %4 {offsets = [0, 256], sizes = [8, 128], strides = [1, 1]} : vector<8x384xbf16> to vector<8x128xbf16>
    %cst_4 = arith.constant dense<0.000000e+00> : vector<8x8xf32>
    %8 = tpu.matmul %5, %6, %cst_4 {dimension_numbers = #tpu.dot_dimension_numbers<[1], [1], [0], [0], [0, 0, 1, 0], [], []>} : vector<8x128xbf16>, vector<8x128xbf16>, vector<8x8xf32> -> vector<8x8xf32>
    %9 = tpu.iota {dimensions = array<i32: 0>} : vector<8x8xi32>
    %10 = tpu.iota {dimensions = array<i32: 1>} : vector<8x8xi32>
    %11 = arith.cmpi sle, %10, %9 : vector<8x8xi32>
    %cst_5 = arith.constant 0xFF800000 : f32
    %12 = vector.broadcast %cst_5 : f32 to vector<8x8xf32>
    %13 = arith.select %11, %8, %12 : vector<8x8xi1>, vector<8x8xf32>
    %cst_6 = arith.constant dense<0xFF800000> : vector<8xf32>
    %14 = vector.multi_reduction <maximumf>, %13, %cst_6 [1] : vector<8x8xf32> to vector<8xf32>
    %15 = vector.shape_cast %14 : vector<8xf32> to vector<8x1xf32>
    %16 = vector.broadcast %15 : vector<8x1xf32> to vector<8x8xf32>
    %17 = arith.subf %13, %16 : vector<8x8xf32>
    %18 = math.exp %17 : vector<8x8xf32>
    %cst_7 = arith.constant dense<0.000000e+00> : vector<8xf32>
    %19 = vector.multi_reduction <add>, %18, %cst_7 [1] : vector<8x8xf32> to vector<8xf32>
    %20 = vector.shape_cast %19 : vector<8xf32> to vector<8x1xf32>
    %21 = arith.truncf %18 : vector<8x8xf32> to vector<8x8xbf16>
    %cst_8 = arith.constant dense<0.000000e+00> : vector<8x128xf32>
    %22 = tpu.matmul %21, %7, %cst_8 {dimension_numbers = #tpu.dot_dimension_numbers<[1], [0], [0], [1], [0, 0, 1, 1], [], []>} : vector<8x8xbf16>, vector<8x128xbf16>, vector<8x128xf32> -> vector<8x128xf32>
    %23 = tpu.reciprocal %20 {approx = true} : vector<8x1xf32> -> vector<8x1xf32>
    %24 = vector.broadcast %23 : vector<8x1xf32> to vector<8x128xf32>
    %25 = arith.mulf %22, %24 : vector<8x128xf32>
    %c0_9 = arith.constant 0 : index
    %c0_10 = arith.constant 0 : index
    %c0_11 = arith.constant 0 : index
    %26 = vector.load %arg3[%c0_9, %c0_10, %c0_11] : memref<1x8x128xf32, #tpu.memory_space<vmem>>, vector<1x8x128xf32>
    %27 = vector.shape_cast %26 : vector<1x8x128xf32> to vector<8x128xf32>
    %28 = vector.shape_cast %25 : vector<8x128xf32> to vector<1x8x128xf32>
    tpu.vector_store %arg3[%c0_9, %c0_10, %c0_11], %28 {strides = array<i32>} : memref<1x8x128xf32, #tpu.memory_space<vmem>>, vector<1x8x128xf32>,
    return
  }
  func.func @transform_0(%arg0: i32) -> (i32, i32, i32) {
    %c0_i32 = arith.constant 0 : i32
    %c0_i32_0 = arith.constant 0 : i32
    %c0_i32_1 = arith.constant 0 : i32
    return %arg0, %c0_i32, %c0_i32_0 : i32, i32, i32
  }
  func.func @transform_1(%arg0: i32) -> (i32, i32) {
    %c0_i32 = arith.constant 0 : i32
    %c0_i32_0 = arith.constant 0 : i32
    %c0_i32_1 = arith.constant 0 : i32
    return %c0_i32, %c0_i32_0 : i32, i32
  }
  func.func @transform_2(%arg0: i32) -> (i32, i32, i32) {
    %c0_i32 = arith.constant 0 : i32
    %c0_i32_0 = arith.constant 0 : i32
    %c0_i32_1 = arith.constant 0 : i32
    return %arg0, %c0_i32, %c0_i32_0 : i32, i32, i32
  }
}

</mosaic_0001>

<bundles_post_ra>
// kernel: tpu_custom_call.1
= control target key start
LH: loop header
LB: loop body
LE: loop exit
PB: predicated region body
PF: predicated region fallthrough
CT: control target
= control target key end

     0   :  { %7 = vsyncpa [#allocation3], 0  ;;  %s1047_s0 = inlined_call_operand.hbm [shape: bf16[2,8,64], index: 0, kind: input, shape index: {}]   ;;  %s1048_s1 = inlined_call_operand.hbm [shape: bf16[64,384], index: 1, kind: input, shape index: {}]   ;;  %s1049_s2 = inlined_call_operand.hbm [shape: f32[2,8,128], index: 2, kind: output, shape index: {}]  }
   0x1   :  { %9 = vsyncpa [#allocation3 + $0x1], 0 }
   0x2   :  { %10 = vsyncpa [#allocation6], 0 }
   0x3   :  { %11 = vsyncpa [#allocation4], 0 }
   0x4   :  { %13 = vsyncpa [#allocation4 + $0x1], 0  ;;  %s842_s9 = smov 0   ;;  %s844_s10 = smov 0  }
   0x5   :  { %s846_s11 = smov 0   ;;  %s848_s12 = smov 0  }
   0x6 LB: > { %s863_s13 = sadd.s32 4294967295, %s817_s12   ;;  %s545_s14 = sadd.s32 4294967294, %s817_s12   ;;  %s817_s12 = sphi %s848_s12, %s1069_s12   ;;  %s813_s11 = sphi %s846_s11, %s1068_s11   ;;  %s809_s10 = sphi %s844_s10, %s1067_s10   ;;  %s805_s9 = sphi %s842_s9, %s1066_s9  }
   0x7   : > { %p39_p0 = scmp.ne.s32.totalorder %s809_s10, %s805_s9  ;;  %p1050_p1 = scmp.eq.s32.totalorder %s863_s13, 0 }
   0x8   : > { %p90_p3 = scmp.eq.s32.totalorder %s545_s14, 1  ;;  %p546_p5 = scmp.ge.s32.totalorder %s817_s12, 1 }
   0x9   : > { %p872_p4 = por %p1050_p1, %p39_p0  ;;  %p97_p7 = scmp.lt.s32.totalorder %s817_s12, 3 }
   0xa   : > { %p877_p6 = por %p90_p3, %p39_p0  ;;  %s819_s18 = smov [#allocation5]  }
   0xb   : > { %s1053_s15 = scalar_select %p872_p4, 1, 0 }
   0xc   : > { %s1054_s16 = scalar_select %p877_p6, 1, 0 }
   0xd   : > { %p882_p8 = pnand %p546_p5, %p97_p7  ;;  %s109_s19 = sshll.u32 %s819_s18, 4  ;;  %s886_s19 = int_to_ptr.vmem [resolvable:$true] %s109_s19 }
   0xe   : > { %s898_s21 = sadd.s32 1, %s817_s12   ;;  %s26_s22 = sadd.s32 1, %s813_s11 }
   0xf   : > { %s1055_s17 = scalar_select %p882_p8, 1, 0 }
  0x10   : > { %p615_p9 = pneg %p882_p8  ;;  %s23_s23 = ssub.s32 %s817_s12, %s898_s21 }
  0x11   : > { %s689_s26 = scalar_lea.hbm %s1048_s1, 1536 }
  0x12   : > { %p893_p11 = pnand %p615_p9, %p1050_p1  ;;  %p690_p12 = scmp.ne.s32.totalorder %s1048_s1, %s689_s26 }
  0x13   : > { %p696_p5 = scmp.lt.u32.totalorder %s689_s26, %s1048_s1 }
  0x14   : > { %p691_p13 = pneg %p893_p11 }
  0x16   : > { %p692_p0 = pnand %p691_p13, %p690_p12 }
  0x18   : > { %p693_p3 = pneg %p692_p0 }
  0x1a   : > { %p698_p7 = pnand %p696_p5, %p693_p3 }
  0x1c   : > { %701 = shalt.err (!%p698_p7)
}
  0x1d   : > { %s702_s3 = scalar_lea.vmem %s886_s19, 1536  ;;  %p710_p2 = scmp.lt.s32.totalorder %s886_s19, %s886_s19 }
  0x1e   : > { %p703_p9 = scmp.ne.s32.totalorder %s886_s19, %s702_s3  ;;  %p711_p6 = scmp.lt.s32.totalorder %s702_s3, %s702_s3 }
  0x20   : > { %p705_p10 = pnand %p703_p9, %p691_p13  ;;  %p712_p4 = por %p711_p6, %p710_p2 }
  0x22   : > { %p706_p1 = pneg %p705_p10 }
  0x24   : > { %p713_p8 = pnand %p712_p4, %p706_p1 }
  0x26   : > { %716 = shalt.err (!%p713_p8)
}
  0x27   : > { %s820_s4 = smov 192   ;;  %s821_s5 = smov 12  }
  0x28   : > { %618 = dma.hbm_to_vmem [thread:$0]  (!%p893_p11), %s1048_s1, 1536, %s886_s19, [#allocation6], %s820_s4, %s820_s4, %s821_s5  }
  0x29   : > { %p24_p2 = scmp.eq.s32.totalorder %s23_s23, 0  ;;  %p33_p1 = scmp.ne.s32.totalorder %s813_s11, %s809_s10 }
  0x2a   : > { %p34_p4 = scmp.eq.s32.totalorder %s817_s12, 0  ;;  %p628_p6 = scmp.lt.s32.totalorder %s817_s12, 2 }
  0x2b   : > { %s929_s8 = scalar_select %p24_p2, %s813_s11, %s26_s22  }
  0x2c   : > { %p35_p8 = por %p34_p4, %p33_p1  ;;  %p1057_p10 = scmp.eq.s32.totalorder %s863_s13, 1 }
  0x2d   : > { %s123_s18 = sand.u32 1, %s813_s11   ;;  %s550_s24 = sshll.u32 %s817_s12, 6 }
  0x2e   : > { %p933_p12 = por %p1057_p10, %p33_p1  ;;  %s549_s25 = sshll.u32 %s123_s18, 2 }
  0x2f   : > { %s942_s27 = scalar_lea.hbm %s1047_s0, %s550_s24  ;;  %s127_s19 = scalar_lea.vmem [#allocation2], %s549_s25 }
  0x30   : > { %s134_s22 = sshll.u32 %s127_s19, 4  ;;  %p944_p11 = pnand %p628_p6, %p35_p8  ;;  %s948_s22 = int_to_ptr.vmem [resolvable:$true] %s134_s22 }
  0x31   : > { %s124_s28 = scalar_lea.sflag [#allocation3], %s123_s18  ;;  %s717_s29 = scalar_lea.hbm %s942_s27, 64 }
  0x32   : > { %p718_p13 = scmp.ne.s32.totalorder %s942_s27, %s717_s29  ;;  %p719_p0 = pneg %p944_p11 }
  0x33   : > { %s722_s4 = scalar_lea.hbm %s1047_s0, 128  ;;  %p723_p7 = scmp.lt.u32.totalorder %s942_s27, %s1047_s0 }
  0x34   : > { %p720_p3 = pnand %p719_p0, %p718_p13  ;;  %p724_p9 = scmp.lt.u32.totalorder %s722_s4, %s717_s29 }
  0x35   : > { %p726_p1 = scmp.lt.u32.totalorder %s717_s29, %s942_s27 }
  0x36   : > { %p721_p5 = pneg %p720_p3  ;;  %p725_p2 = por %p724_p9, %p723_p7 }
  0x38   : > { %p727_p4 = por %p726_p1, %p725_p2 }
  0x3a   : > { %p728_p6 = pnand %p727_p4, %p721_p5 }
  0x3c   : > { %731 = shalt.err (!%p728_p6)
}
  0x3d   : > { %s732_s7 = scalar_lea.vmem %s948_s22, 64  ;;  %s822_s18 = smov [#allocation2]  }
  0x3e   : > { %p733_p8 = scmp.ne.s32.totalorder %s948_s22, %s732_s7  ;;  %s737_s24 = sshll.u32 %s822_s18, 4  ;;  %s738_s24 = int_to_ptr.vmem [resolvable:$false] %s737_s24 }
  0x3f   : > { %s739_s25 = scalar_lea.vmem %s738_s24, 128  ;;  %p740_p3 = scmp.lt.s32.totalorder %s948_s22, %s738_s24 }
  0x40   : > { %p735_p10 = pnand %p733_p8, %p719_p0  ;;  %p741_p7 = scmp.lt.s32.totalorder %s739_s25, %s732_s7 }
  0x42   : > { %p736_p13 = pneg %p735_p10  ;;  %p742_p9 = por %p741_p7, %p740_p3 }
  0x44   : > { %p743_p2 = pnand %p742_p9, %p736_p13 }
  0x46   : > { %746 = shalt.err (!%p743_p2)
}
  0x47   : > { %622 = dma.hbm_to_vmem [thread:$0]  (!%p944_p11), %s942_s27, 64, %s948_s22, %s124_s28  }
  0x48   : > { %p1060_p5 = scmp.ne.s32.totalorder %s1055_s17, 0 }
  0x49   : > { %s978_s20 = sand.u32 (!%p1060_p5), 1, %s809_s10   ;;  %p1061_p0 = scmp.ne.s32.totalorder (!%p1060_p5), %s1053_s15, 0 }
  0x4a   : > { %143 = sbr.rel (%p1060_p5) target bundleno = 925 (0x39d), region = 28  ;;  %s552_s26 = sshll.u32 (!%p1060_p5), %s978_s20, 2 }
  0x4b   : > { %s146_s19 = scalar_lea.sflag (!%p1060_p5), [#allocation3], %s978_s20  ;;  %s149_s29 = scalar_lea.vmem (!%p1060_p5), [#allocation2], %s552_s26 }
  0x51   : > { %792 = dma.done.wait (%p1061_p0), %s146_s19, 64  }
  0x52   : > { %794 = vsyncadd (%p1061_p0), %s146_s19, 4294967232  ;;  %p1062_p1 = scmp.eq.s32.totalorder %s863_s13, 0 }
  0x54   : > { %796 = dma.done.wait (%p1062_p1), [#allocation6], 1536   ;;  %p1063_p11 = pmov %p1062_p1 }
  0x55   : > { %v823_v0 = vmov 0   ;;  %v669_v1 = vld [vmem:[#allocation5 + $0x4] ss:$12 sps:$4 sm:$0xff]   ;;  %v671_v2 = vld [vmem:[#allocation5] ss:$12 sps:$4 sm:$0xff]   ;;  %vm256_vm0 = vcmask 523264   ;;  %v384_v21 = vlaneseq }
  0x56   : > { %798 = vsyncadd (%p1063_p11), [#allocation6], 4294965760  ;;  %292 = vmatprep.mubr.bf16.mxu0 %v823_v0  ;;  %260 = vmatprep.subr.bf16.mxu0 %v669_v1  ;;  %v672_v3 = vld [vmem:[#allocation5 + $0x1c] ss:$12 sps:$4 sm:$0xff]   ;;  %v674_v4 = vld [vmem:[#allocation5 + $0x18] ss:$12 sps:$4 sm:$0xff]  }
  0x57   : > { %261 = vmatpush1.bf16.msra.mxu0 %v671_v2  ;;  %v675_v5 = vld [vmem:[#allocation5 + $0x34] ss:$12 sps:$4 sm:$0xff]   ;;  %v677_v6 = vld [vmem:[#allocation5 + $0x30] ss:$12 sps:$4 sm:$0xff]   ;;  %v678_v7 = vld [vmem:[#allocation5 + $0x4c] ss:$12 sps:$4 sm:$0xff]  }
  0x58   : > { %262 = vmatprep.subr.bf16.mxu0 %v672_v3  ;;  %v680_v8 = vld [vmem:[#allocation5 + $0x48] ss:$12 sps:$4 sm:$0xff]   ;;  %v175_v9 = vld [vmem:[%s149_s29] sm:$0xf]  ;;  %v824_v10 = vmov 0.0   ;;  %vm825_vm1 = vmmov 0  }
  0x59   : > { %583 = vmatprep.subr.bf16.mxu1 %v824_v10  ;;  %591 = vmatprep.mubr.msk.bf16.mxu1 %vm825_vm1, %v824_v10  ;;  %v681_v11 = vld [vmem:[#allocation5 + $0x8] ss:$12 sps:$4 sm:$0xff]   ;;  %v682_v12 = vld [vmem:[#allocation5 + $0x20] ss:$12 sps:$4 sm:$0xff]   ;;  %v683_v13 = vld [vmem:[#allocation5 + $0x38] ss:$12 sps:$4 sm:$0xff]  }
  0x5a   : > { %584 = vmatpush3.bf16.msra.mxu1 %v681_v11  ;;  %v684_v14 = vld [vmem:[#allocation5 + $0x50] ss:$12 sps:$4 sm:$0xff]   ;;  %v385_v22 = vshrl.u32 %v384_v21, 7  ;;  %v387_v23 = vand.u32 127, %v384_v21  ;;  %vm390_vm3 = vcmask 64512   ;;  %vm404_vm4 = vcmask 1043456  }
  0x5b   : > { %263 = vmatpush1.bf16.msra.mxu0 %v674_v4  ;;  %585 = vmatprep.subr.bf16.mxu1 %v824_v10  ;;  %s554_s15 = sshll.u32 %s978_s20, 3  ;;  %s571_s17 = sshll.u32 %s863_s13, 7 }
  0x5c   : > { %264 = vmatprep.subr.bf16.mxu0 %v675_v5  ;;  %vm388_vm2 = vcmp.le.s32.totalorder %v387_v23, %v385_v22  ;;  %s173_s27 = scalar_lea.vmem [#allocation7], %s554_s15  ;;  %s1003_s30 = scalar_lea.hbm %s1049_s2, %s571_s17 }
  0x5d   : > { %s465_s22 = sshll.u32 %s173_s27, 4  ;;  %s452_s13 = scalar_lea.sflag [#allocation4], %s978_s20  ;;  %s1005_s22 = int_to_ptr.vmem [resolvable:$true] %s465_s22 }
  0x5e   : > { %586 = vmatpush3.bf16.msra.mxu1 %v682_v12  ;;  %s747_s3 = scalar_lea.vmem %s1005_s22, 128  ;;  %s826_s4 = smov [#allocation7]  }
  0x5f   : > { %265 = vmatpush1.bf16.msra.mxu0 %v677_v6  ;;  %587 = vmatprep.subr.bf16.mxu1 %v824_v10  ;;  %p748_p4 = scmp.ne.s32.totalorder %s1005_s22, %s747_s3  ;;  %s751_s5 = sshll.u32 %s826_s4, 4  ;;  %s752_s5 = int_to_ptr.vmem [resolvable:$false] %s751_s5 }
  0x60   : > { %266 = vmatprep.subr.bf16.mxu0 %v678_v7  ;;  %s753_s6 = scalar_lea.vmem %s752_s5, 256  ;;  %p754_p10 = scmp.lt.s32.totalorder %s1005_s22, %s752_s5 }
  0x61   : > { %p749_p6 = pnand %p748_p4, %p933_p12  ;;  %p755_p13 = scmp.lt.s32.totalorder %s753_s6, %s747_s3 }
  0x62   : > { %588 = vmatpush3.bf16.msra.mxu1 %v683_v13 }
  0x63   : > { %267 = vmatpush1.bf16.msra.mxu0 %v680_v8  ;;  %589 = vmatprep.subr.bf16.mxu1 %v824_v10  ;;  %p750_p8 = pneg %p749_p6  ;;  %p756_p3 = por %p755_p13, %p754_p10 }
  0x64   : > { %595 = vmatprep.subr.bf16.mxu0 %v824_v10 }
  0x65   : > { %p757_p7 = pnand %p756_p3, %p750_p8 }
  0x66   : > { %567 = vmatmul.mubr.msk.bf16.vlgmr.msra.gmra.mrb[0].mxu0 %vm256_vm0, %v175_v9  ;;  %590 = vmatpush3.bf16.msra.mxu1 %v684_v14 }
  0x67   : > { %597 = vmatprep.mubr.msk.bf16.mxu0 %vm825_vm1, %v824_v10  ;;  %601 = vmatprep.subr.bf16.mxu1 %v824_v10 }
  0x69   : > { %592 = vmatmul.mubr.msk.bf16.vlgmr.msra.gmra.mrb[0].mxu1 %vm256_vm0, %v175_v9 }
  0x6a   : > { %603 = vmatprep.mubr.msk.bf16.mxu1 %vm825_vm1, %v824_v10 }
 0x139   : > { %v294_v15 = vpop.f32.mrb[0].mxu0 }
 0x13a   : > { %v296_v16 = vpop.f32.mrb[1].mxu0  ;;  %v341_v20 = vpack.c.bf16 %v294_v15, %v294_v15 }
 0x13b   : > { %v342_v17 = vpack.c.bf16 %v296_v16, %v296_v16  ;;  %v298_v18 = vpop.f32.mrb[2].mxu0 }
 0x13c   : > { %v299_v19 = vpop.f32.mrb[3].mxu0  ;;  %v335_v30 = vpop.f32.mrb[0].mxu1 }
 0x13d   : > { %596 = vmatpush3.bf16.xpose.msra.mxu0 %v342_v17  ;;  %v343_v31 = vpack.c.bf16 %v335_v30, %v335_v30  ;;  %v593_v32 = vpop.f32.mrb[1].mxu1 }
 0x13e   : > { %v338_v33 = vpop.f32.mrb[2].mxu1 }
 0x13f   : > { %v406_v34 = vsel %vm404_vm4, %v343_v31, 0  ;;  %v594_v35 = vpop.f32.mrb[3].mxu1 }
 0x140   : > { %602 = vmatpush3.bf16.msra.mxu1 %v406_v34 }
 0x144   : > { %598 = vmatmul.mubr.bf16.vlgmr.msra.gmra.mrb[4].mxu0 %v341_v20 }
 0x217   : > { %v378_v24 = vpop.f32.mrb[4].mxu0 }
 0x218   : > { %v389_v25 = vsel %vm388_vm2, %v378_v24, -inf  ;;  %v599_v26 = vpop.f32.mrb[5].mxu0 }
 0x219   : > { %v381_v27 = vpop.f32.mrb[6].mxu0  ;;  %v391_v28 = vsel %vm390_vm3, %v389_v25, -inf }
 0x21a   : > { %392 = vmax.xlane.f32.xlu0 %v391_v28  ;;  %v600_v29 = vpop.f32.mrb[7].mxu0 }
 0x2a7   : > { %v393_v36 = vpop.xlane.xlu0 %392 }
 0x2a8   : > { %v394_v37 = vsub.f32 %v389_v25, %v393_v36 }
 0x2aa   : > { %v395_v38 = vmul.f32 1.442695, %v394_v37 }
 0x2ac   : > { %685 = vpow2.f32 %v395_v38 }
 0x2b6   : > { %v686_v39 = vpop.eup %685 }
 0x2b7   : > { %v397_v40 = vsel %vm390_vm3, %v686_v39, 0.0  ;;  %v400_v41 = vpack.c.bf16 %v686_v39, %v686_v39 }
 0x2b8   : > { %398 = vadd.xlane.f32.xlu0 %v397_v40 }
 0x2b9   : > { %604 = vmatmul.mubr.msk.bf16.vlgmr.msra.gmra.mrb[4].mxu1 %vm390_vm3, %v400_v41 }
 0x345   : > { %v399_v42 = vpop.xlane.xlu0 %398 }
 0x346   : > { %687 = vrcp.f32 %v399_v42 }
 0x350   : > { %v688_v43 = vpop.eup %687 }
 0x38c   : > { %v442_v44 = vpop.f32.mrb[4].mxu1 }
 0x38d   : > { %v449_v45 = vmul.f32 %v688_v43, %v442_v44  ;;  %v605_v46 = vpop.f32.mrb[5].mxu1 }
 0x38e   : > { %v445_v47 = vpop.f32.mrb[6].mxu1 }
 0x38f   : > { %450 = vst [vmem:[%s173_s27] sm:$0xff] %v449_v45  ;;  %v606_v48 = vpop.f32.mrb[7].mxu1 }
 0x390   : > { %760 = shalt.err (!%p757_p7)
}
 0x391   : > { %s761_s7 = scalar_lea.hbm %s1003_s30, 128  ;;  %s765_s25 = scalar_lea.hbm %s1049_s2, 256 }
 0x392   : > { %p762_p9 = scmp.ne.s32.totalorder %s1003_s30, %s761_s7  ;;  %p766_p0 = scmp.lt.u32.totalorder %s1003_s30, %s1049_s2 }
 0x393   : > { %p767_p1 = scmp.lt.u32.totalorder %s765_s25, %s761_s7  ;;  %p769_p4 = scmp.lt.u32.totalorder %s761_s7, %s1003_s30 }
 0x394   : > { %p763_p2 = pnand %p762_p9, %p933_p12 }
 0x395   : > { %p768_p11 = por %p767_p1, %p766_p0 }
 0x396   : > { %p764_p5 = pneg %p763_p2 }
 0x397   : > { %p770_p6 = por %p769_p4, %p768_p11 }
 0x399   : > { %p771_p8 = pnand %p770_p6, %p764_p5 }
 0x39b   : > { %774 = shalt.err (!%p771_p8)
}
 0x39c   : > { %613 = dma.vmem_to_hbm [thread:$0]  (%p933_p12), %s1005_s22, 128, %s1003_s30, %s452_s13  }
 0x39d PF: > { %s477_s19 = sand.u32 1, %s805_s9   ;;  %p1064_p10 = scmp.ne.s32.totalorder %s1054_s16, 0 }
 0x39e   : > { %p1065_p13 = scmp.ge.s32.totalorder %s817_s12, 2  ;;  %s478_s29 = scalar_lea.sflag [#allocation4], %s477_s19 }
 0x3a0   : > { %p624_p3 = pnand %p1065_p13, %p1064_p10 }
 0x3a2   : > { %800 = dma.done.wait (!%p624_p3), %s478_s29, 128  }
 0x3a3   : > { %802 = vsyncadd (!%p624_p3), %s478_s29, 4294967168  ;;  %p16_p7 = scmp.ge.s32.totalorder %s898_s21, 4   ;;  %s1066_s9 = smov %s809_s10 }
 0x3a4   : > { %s1067_s10 = smov %s813_s11  ;;  %s1068_s11 = smov %s929_s8 }
 0x3a5   : > { %s1069_s12 = smov %s898_s21  ;;  %18 = sbr.rel (!%p16_p7) target bundleno = 6 (0x6), region = 77 }
 0x3ac   :  { %483 = vsyncpa [#allocation3], 1 }
 0x3ad   :  { %485 = vsyncpa [#allocation3 + $0x1], 1 }
 0x3ae   :  { %486 = vsyncpa [#allocation6], 1 }
 0x3af   :  { %487 = vsyncpa [#allocation4], 1 }
 0x3b0   :  { %489 = vsyncpa [#allocation4 + $0x1], 1 }

</bundles_post_ra>
